<compile_context>
chip_gen: v5e
topology: v5e:2x2
jax: 0.10.0
libtpu: 0.0.40
codegen_flags: <defaults>
</compile_context>

<pallas_src>
import jax
import jax.numpy as jnp
from jax.experimental import pallas as pl
from jax.experimental.pallas import tpu as pltpu


def _round_up(x, m):
    return ((x + m - 1) // m) * m


# ------------------------------ Pallas kernel ------------------------------ #
def _critic_q1_kernel(x_ref,
                      w1_ref, b1_ref, w2_ref, b2_ref, w3_ref, b3_ref,
                      w4_ref, b4_ref, w5_ref, b5_ref,
                      o_ref):
    bf16 = jnp.bfloat16

    def dense(h_bf16, w_ref, b_ref):
        # bf16 x bf16 -> f32 accumulate on the MXU, f32 bias add on the VPU.
        y = jnp.dot(h_bf16, w_ref[...], preferred_element_type=jnp.float32)
        return y + b_ref[...]

    h = dense(x_ref[...], w1_ref, b1_ref)              # Linear(S+A, mid)
    h = jnp.maximum(h, 0.0)                            # ReLU
    h = dense(h.astype(bf16), w2_ref, b2_ref)          # Linear(mid, mid)
    h = jnp.maximum(h, 0.0)                            # ReLU
    h = dense(h.astype(bf16), w3_ref, b3_ref)          # Linear(mid, mid)
    h = jnp.maximum(h, 0.0)                            # ReLU
    h = dense(h.astype(bf16), w4_ref, b4_ref)          # Linear(mid, mid)
    h = h * jnp.clip(h + 3.0, 0.0, 6.0) * (1.0 / 6.0)  # Hardswish (f32)
    q = dense(h.astype(bf16), w5_ref, b5_ref)          # Linear(mid, 1) (padded)
    o_ref[...] = q.astype(o_ref.dtype)


# -------------------------------- wrapper ---------------------------------- #
def critic_q1_forward(state, action, params, *, tm=512):
    """Q1 = net_q1(net_sa(cat(state, action))).  Returns (B, 1) float32."""
    x = jnp.concatenate([state, action], axis=1)
    M, K = x.shape
    mid = params["w2"].shape[0]

    Kp = _round_up(K, 128)        # padded input-feature dim
    Hp = _round_up(mid, 128)      # padded hidden dim
    Np = 128                      # padded output dim (real out_dim = 1)

    def pad_w(w, kp, np_):
        k, n = w.shape
        return jnp.pad(w, ((0, kp - k), (0, np_ - n))).astype(jnp.bfloat16)

    def pad_b(b, np_):
        return jnp.pad(b, (0, np_ - b.shape[0])).reshape(1, np_).astype(jnp.float32)

    w1 = pad_w(params["w1"], Kp, Hp); b1 = pad_b(params["b1"], Hp)
    w2 = pad_w(params["w2"], Hp, Hp); b2 = pad_b(params["b2"], Hp)
    w3 = pad_w(params["w3"], Hp, Hp); b3 = pad_b(params["b3"], Hp)
    w4 = pad_w(params["w4"], Hp, Hp); b4 = pad_b(params["b4"], Hp)
    w5 = pad_w(params["w5"], Hp, Np); b5 = pad_b(params["b5"], Np)

    # Zero-pad input features (padded weight rows are zero -> no effect) and
    # pad the batch up to the row tile (padded rows are sliced away).
    xp = jnp.pad(x, ((0, 0), (0, Kp - K))).astype(jnp.bfloat16)
    tm = min(tm, _round_up(max(M, 8), 8))
    Mp = _round_up(M, tm)
    if Mp != M:
        xp = jnp.pad(xp, ((0, Mp - M), (0, 0)))

    const = lambda i: (0, 0)
    out = pl.pallas_call(
        _critic_q1_kernel,
        out_shape=jax.ShapeDtypeStruct((Mp, Np), jnp.float32),
        grid_spec=pltpu.PrefetchScalarGridSpec(
            num_scalar_prefetch=0,
            grid=(Mp // tm,),
            in_specs=[
                pl.BlockSpec((tm, Kp), lambda i: (i, 0)),   # activations tile
                pl.BlockSpec((Kp, Hp), const), pl.BlockSpec((1, Hp), const),
                pl.BlockSpec((Hp, Hp), const), pl.BlockSpec((1, Hp), const),
                pl.BlockSpec((Hp, Hp), const), pl.BlockSpec((1, Hp), const),
                pl.BlockSpec((Hp, Hp), const), pl.BlockSpec((1, Hp), const),
                pl.BlockSpec((Hp, Np), const), pl.BlockSpec((1, Np), const),
            ],
            out_specs=pl.BlockSpec((tm, Np), lambda i: (i, 0)),
        ),
        compiler_params=pltpu.CompilerParams(
            dimension_semantics=("parallel",)),
    )(xp, w1, b1, w2, b2, w3, b3, w4, b4, w5, b5)

    return out[:M, :1]            # strip batch padding + padded output lanes


# --------------------------- plain-JAX reference ---------------------------- #
def reference_forward(state, action, params):
    x = jnp.concatenate([state, action], axis=1)
    h = jax.nn.relu(x @ params["w1"] + params["b1"])
    h = jax.nn.relu(h @ params["w2"] + params["b2"])
    h = jax.nn.relu(h @ params["w3"] + params["b3"])
    h = h @ params["w4"] + params["b4"]
    h = h * jnp.clip(h + 3.0, 0.0, 6.0) / 6.0       # Hardswish
    return h @ params["w5"] + params["b5"]


# ----------------------------------- main ----------------------------------- #
def init_params(key, state_dim, action_dim, mid_dim):
    ks = jax.random.split(key, 10)
    k_in = state_dim + action_dim
    s_in = 1.0 / jnp.sqrt(k_in)
    s_md = 1.0 / jnp.sqrt(mid_dim)
    return {
        # Linear weights stored (in, out); biases (out,).
        "w1": s_in * jax.random.normal(ks[0], (k_in, mid_dim), jnp.float32),
        "b1": 0.1 * jax.random.normal(ks[1], (mid_dim,), jnp.float32),
        "w2": s_md * jax.random.normal(ks[2], (mid_dim, mid_dim), jnp.float32),
        "b2": 0.1 * jax.random.normal(ks[3], (mid_dim,), jnp.float32),
        "w3": s_md * jax.random.normal(ks[4], (mid_dim, mid_dim), jnp.float32),
        "b3": 0.1 * jax.random.normal(ks[5], (mid_dim,), jnp.float32),
        "w4": s_md * jax.random.normal(ks[6], (mid_dim, mid_dim), jnp.float32),
        "b4": 0.1 * jax.random.normal(ks[7], (mid_dim,), jnp.float32),
        "w5": s_md * jax.random.normal(ks[8], (mid_dim, 1), jnp.float32),
        "b5": 0.1 * jax.random.normal(ks[9], (1,), jnp.float32),
    }


if __name__ == "__main__":
    key = jax.random.PRNGKey(0)
    k_s, k_a, k_p = jax.random.split(key, 3)

    B, STATE_DIM, ACTION_DIM, MID_DIM = 2, 16, 4, 32
    state = jax.random.normal(k_s, (B, STATE_DIM), jnp.float32)
    action = jax.random.normal(k_a, (B, ACTION_DIM), jnp.float32)
    params = init_params(k_p, STATE_DIM, ACTION_DIM, MID_DIM)

    q1 = jax.block_until_ready(critic_q1_forward(state, action, params))
    assert q1.shape == (B, 1), q1.shape

    q1_ref = jax.block_until_ready(reference_forward(state, action, params))
    err = float(jnp.max(jnp.abs(q1 - q1_ref)))
    denom = 1.0 + float(jnp.max(jnp.abs(q1_ref)))
    assert err <= 2e-2 * denom, f"mismatch vs reference: {err}"

    print("KERNEL_OK")
</pallas_src>

<mosaic_0001>
module attributes {stable_mosaic.version = 11 : i64} {
  func.func @_critic_q1_kernel(%arg0: i32, %arg1: memref<8x128xbf16, #tpu.memory_space<vmem>>, %arg2: memref<128x128xbf16, #tpu.memory_space<vmem>>, %arg3: memref<1x128xf32, #tpu.memory_space<vmem>>, %arg4: memref<128x128xbf16, #tpu.memory_space<vmem>>, %arg5: memref<1x128xf32, #tpu.memory_space<vmem>>, %arg6: memref<128x128xbf16, #tpu.memory_space<vmem>>, %arg7: memref<1x128xf32, #tpu.memory_space<vmem>>, %arg8: memref<128x128xbf16, #tpu.memory_space<vmem>>, %arg9: memref<1x128xf32, #tpu.memory_space<vmem>>, %arg10: memref<128x128xbf16, #tpu.memory_space<vmem>>, %arg11: memref<1x128xf32, #tpu.memory_space<vmem>>, %arg12: memref<8x128xf32, #tpu.memory_space<vmem>>) attributes {dimension_semantics = [#tpu.dimension_semantics<parallel>], iteration_bounds = array<i64: 1>, scalar_prefetch = 0 : i64, scratch_operands = 0 : i64, tpu.core_type = #tpu.core_type<tc>, window_params = [{transform_indices = @transform_0, window_bounds = array<i64: 8, 128>}, {pipeline_mode = #tpu.pipeline_mode<synchronous>, transform_indices = @transform_1, window_bounds = array<i64: 128, 128>}, {pipeline_mode = #tpu.pipeline_mode<synchronous>, transform_indices = @transform_2, window_bounds = array<i64: 1, 128>}, {pipeline_mode = #tpu.pipeline_mode<synchronous>, transform_indices = @transform_3, window_bounds = array<i64: 128, 128>}, {pipeline_mode = #tpu.pipeline_mode<synchronous>, transform_indices = @transform_4, window_bounds = array<i64: 1, 128>}, {pipeline_mode = #tpu.pipeline_mode<synchronous>, transform_indices = @transform_5, window_bounds = array<i64: 128, 128>}, {pipeline_mode = #tpu.pipeline_mode<synchronous>, transform_indices = @transform_6, window_bounds = array<i64: 1, 128>}, {pipeline_mode = #tpu.pipeline_mode<synchronous>, transform_indices = @transform_7, window_bounds = array<i64: 128, 128>}, {pipeline_mode = #tpu.pipeline_mode<synchronous>, transform_indices = @transform_8, window_bounds = array<i64: 1, 128>}, {pipeline_mode = #tpu.pipeline_mode<synchronous>, transform_indices = @transform_9, window_bounds = array<i64: 128, 128>}, {pipeline_mode = #tpu.pipeline_mode<synchronous>, transform_indices = @transform_10, window_bounds = array<i64: 1, 128>}, {transform_indices = @transform_11, window_bounds = array<i64: 8, 128>}]} {
    %c0 = arith.constant 0 : index
    %c0_0 = arith.constant 0 : index
    %0 = vector.load %arg1[%c0, %c0_0] : memref<8x128xbf16, #tpu.memory_space<vmem>>, vector<8x128xbf16>
    %c0_1 = arith.constant 0 : index
    %c0_2 = arith.constant 0 : index
    %1 = vector.load %arg2[%c0_1, %c0_2] : memref<128x128xbf16, #tpu.memory_space<vmem>>, vector<128x128xbf16>
    %cst = arith.constant dense<0.000000e+00> : vector<8x128xf32>
    %2 = tpu.matmul %0, %1, %cst {dimension_numbers = #tpu.dot_dimension_numbers<[1], [0], [0], [1], [0, 0, 1, 1], [], []>} : vector<8x128xbf16>, vector<128x128xbf16>, vector<8x128xf32> -> vector<8x128xf32>
    %c0_3 = arith.constant 0 : index
    %c0_4 = arith.constant 0 : index
    %3 = vector.load %arg3[%c0_3, %c0_4] : memref<1x128xf32, #tpu.memory_space<vmem>>, vector<1x128xf32>
    %4 = vector.broadcast %3 : vector<1x128xf32> to vector<8x128xf32>
    %5 = arith.addf %2, %4 : vector<8x128xf32>
    %cst_5 = arith.constant 0.000000e+00 : f32
    %6 = vector.broadcast %cst_5 : f32 to vector<8x128xf32>
    %7 = arith.maximumf %5, %6 : vector<8x128xf32>
    %8 = arith.truncf %7 : vector<8x128xf32> to vector<8x128xbf16>
    %c0_6 = arith.constant 0 : index
    %c0_7 = arith.constant 0 : index
    %9 = vector.load %arg4[%c0_6, %c0_7] : memref<128x128xbf16, #tpu.memory_space<vmem>>, vector<128x128xbf16>
    %cst_8 = arith.constant dense<0.000000e+00> : vector<8x128xf32>
    %10 = tpu.matmul %8, %9, %cst_8 {dimension_numbers = #tpu.dot_dimension_numbers<[1], [0], [0], [1], [0, 0, 1, 1], [], []>} : vector<8x128xbf16>, vector<128x128xbf16>, vector<8x128xf32> -> vector<8x128xf32>
    %c0_9 = arith.constant 0 : index
    %c0_10 = arith.constant 0 : index
    %11 = vector.load %arg5[%c0_9, %c0_10] : memref<1x128xf32, #tpu.memory_space<vmem>>, vector<1x128xf32>
    %12 = vector.broadcast %11 : vector<1x128xf32> to vector<8x128xf32>
    %13 = arith.addf %10, %12 : vector<8x128xf32>
    %cst_11 = arith.constant 0.000000e+00 : f32
    %14 = vector.broadcast %cst_11 : f32 to vector<8x128xf32>
    %15 = arith.maximumf %13, %14 : vector<8x128xf32>
    %16 = arith.truncf %15 : vector<8x128xf32> to vector<8x128xbf16>
    %c0_12 = arith.constant 0 : index
    %c0_13 = arith.constant 0 : index
    %17 = vector.load %arg6[%c0_12, %c0_13] : memref<128x128xbf16, #tpu.memory_space<vmem>>, vector<128x128xbf16>
    %cst_14 = arith.constant dense<0.000000e+00> : vector<8x128xf32>
    %18 = tpu.matmul %16, %17, %cst_14 {dimension_numbers = #tpu.dot_dimension_numbers<[1], [0], [0], [1], [0, 0, 1, 1], [], []>} : vector<8x128xbf16>, vector<128x128xbf16>, vector<8x128xf32> -> vector<8x128xf32>
    %c0_15 = arith.constant 0 : index
    %c0_16 = arith.constant 0 : index
    %19 = vector.load %arg7[%c0_15, %c0_16] : memref<1x128xf32, #tpu.memory_space<vmem>>, vector<1x128xf32>
    %20 = vector.broadcast %19 : vector<1x128xf32> to vector<8x128xf32>
    %21 = arith.addf %18, %20 : vector<8x128xf32>
    %cst_17 = arith.constant 0.000000e+00 : f32
    %22 = vector.broadcast %cst_17 : f32 to vector<8x128xf32>
    %23 = arith.maximumf %21, %22 : vector<8x128xf32>
    %24 = arith.truncf %23 : vector<8x128xf32> to vector<8x128xbf16>
    %c0_18 = arith.constant 0 : index
    %c0_19 = arith.constant 0 : index
    %25 = vector.load %arg8[%c0_18, %c0_19] : memref<128x128xbf16, #tpu.memory_space<vmem>>, vector<128x128xbf16>
    %cst_20 = arith.constant dense<0.000000e+00> : vector<8x128xf32>
    %26 = tpu.matmul %24, %25, %cst_20 {dimension_numbers = #tpu.dot_dimension_numbers<[1], [0], [0], [1], [0, 0, 1, 1], [], []>} : vector<8x128xbf16>, vector<128x128xbf16>, vector<8x128xf32> -> vector<8x128xf32>
    %c0_21 = arith.constant 0 : index
    %c0_22 = arith.constant 0 : index
    %27 = vector.load %arg9[%c0_21, %c0_22] : memref<1x128xf32, #tpu.memory_space<vmem>>, vector<1x128xf32>
    %28 = vector.broadcast %27 : vector<1x128xf32> to vector<8x128xf32>
    %29 = arith.addf %26, %28 : vector<8x128xf32>
    %cst_23 = arith.constant 3.000000e+00 : f32
    %30 = vector.broadcast %cst_23 : f32 to vector<8x128xf32>
    %31 = arith.addf %29, %30 : vector<8x128xf32>
    %cst_24 = arith.constant 0.000000e+00 : f32
    %cst_25 = arith.constant 6.000000e+00 : f32
    %32 = vector.broadcast %cst_24 : f32 to vector<8x128xf32>
    %33 = arith.maximumf %32, %31 : vector<8x128xf32>
    %34 = vector.broadcast %cst_25 : f32 to vector<8x128xf32>
    %35 = arith.minimumf %34, %33 : vector<8x128xf32>
    %36 = arith.mulf %29, %35 : vector<8x128xf32>
    %cst_26 = arith.constant 0.166666672 : f32
    %37 = vector.broadcast %cst_26 : f32 to vector<8x128xf32>
    %38 = arith.mulf %36, %37 : vector<8x128xf32>
    %39 = arith.truncf %38 : vector<8x128xf32> to vector<8x128xbf16>
    %c0_27 = arith.constant 0 : index
    %c0_28 = arith.constant 0 : index
    %40 = vector.load %arg10[%c0_27, %c0_28] : memref<128x128xbf16, #tpu.memory_space<vmem>>, vector<128x128xbf16>
    %cst_29 = arith.constant dense<0.000000e+00> : vector<8x128xf32>
    %41 = tpu.matmul %39, %40, %cst_29 {dimension_numbers = #tpu.dot_dimension_numbers<[1], [0], [0], [1], [0, 0, 1, 1], [], []>} : vector<8x128xbf16>, vector<128x128xbf16>, vector<8x128xf32> -> vector<8x128xf32>
    %c0_30 = arith.constant 0 : index
    %c0_31 = arith.constant 0 : index
    %42 = vector.load %arg11[%c0_30, %c0_31] : memref<1x128xf32, #tpu.memory_space<vmem>>, vector<1x128xf32>
    %43 = vector.broadcast %42 : vector<1x128xf32> to vector<8x128xf32>
    %44 = arith.addf %41, %43 : vector<8x128xf32>
    %c0_32 = arith.constant 0 : index
    %c0_33 = arith.constant 0 : index
    %45 = vector.load %arg12[%c0_32, %c0_33] : memref<8x128xf32, #tpu.memory_space<vmem>>, vector<8x128xf32>
    tpu.vector_store %arg12[%c0_32, %c0_33], %44 {strides = array<i32>} : memref<8x128xf32, #tpu.memory_space<vmem>>, vector<8x128xf32>,
    return
  }
  func.func @transform_0(%arg0: i32) -> (i32, i32) {
    %c0_i32 = arith.constant 0 : i32
    %c0_i32_0 = arith.constant 0 : i32
    return %arg0, %c0_i32 : i32, i32
  }
  func.func @transform_1(%arg0: i32) -> (i32, i32) {
    %c0_i32 = arith.constant 0 : i32
    %c0_i32_0 = arith.constant 0 : i32
    %c0_i32_1 = arith.constant 0 : i32
    return %c0_i32, %c0_i32_0 : i32, i32
  }
  func.func @transform_2(%arg0: i32) -> (i32, i32) {
    %c0_i32 = arith.constant 0 : i32
    %c0_i32_0 = arith.constant 0 : i32
    %c0_i32_1 = arith.constant 0 : i32
    return %c0_i32, %c0_i32_0 : i32, i32
  }
  func.func @transform_3(%arg0: i32) -> (i32, i32) {
    %c0_i32 = arith.constant 0 : i32
    %c0_i32_0 = arith.constant 0 : i32
    %c0_i32_1 = arith.constant 0 : i32
    return %c0_i32, %c0_i32_0 : i32, i32
  }
  func.func @transform_4(%arg0: i32) -> (i32, i32) {
    %c0_i32 = arith.constant 0 : i32
    %c0_i32_0 = arith.constant 0 : i32
    %c0_i32_1 = arith.constant 0 : i32
    return %c0_i32, %c0_i32_0 : i32, i32
  }
  func.func @transform_5(%arg0: i32) -> (i32, i32) {
    %c0_i32 = arith.constant 0 : i32
    %c0_i32_0 = arith.constant 0 : i32
    %c0_i32_1 = arith.constant 0 : i32
    return %c0_i32, %c0_i32_0 : i32, i32
  }
  func.func @transform_6(%arg0: i32) -> (i32, i32) {
    %c0_i32 = arith.constant 0 : i32
    %c0_i32_0 = arith.constant 0 : i32
    %c0_i32_1 = arith.constant 0 : i32
    return %c0_i32, %c0_i32_0 : i32, i32
  }
  func.func @transform_7(%arg0: i32) -> (i32, i32) {
    %c0_i32 = arith.constant 0 : i32
    %c0_i32_0 = arith.constant 0 : i32
    %c0_i32_1 = arith.constant 0 : i32
    return %c0_i32, %c0_i32_0 : i32, i32
  }
  func.func @transform_8(%arg0: i32) -> (i32, i32) {
    %c0_i32 = arith.constant 0 : i32
    %c0_i32_0 = arith.constant 0 : i32
    %c0_i32_1 = arith.constant 0 : i32
    return %c0_i32, %c0_i32_0 : i32, i32
  }
  func.func @transform_9(%arg0: i32) -> (i32, i32) {
    %c0_i32 = arith.constant 0 : i32
    %c0_i32_0 = arith.constant 0 : i32
    %c0_i32_1 = arith.constant 0 : i32
    return %c0_i32, %c0_i32_0 : i32, i32
  }
  func.func @transform_10(%arg0: i32) -> (i32, i32) {
    %c0_i32 = arith.constant 0 : i32
    %c0_i32_0 = arith.constant 0 : i32
    %c0_i32_1 = arith.constant 0 : i32
    return %c0_i32, %c0_i32_0 : i32, i32
  }
  func.func @transform_11(%arg0: i32) -> (i32, i32) {
    %c0_i32 = arith.constant 0 : i32
    %c0_i32_0 = arith.constant 0 : i32
    return %arg0, %c0_i32 : i32, i32
  }
}

</mosaic_0001>

<bundles_post_ra>
// kernel: tpu_custom_call.1
= control target key start
LH: loop header
LB: loop body
LE: loop exit
PB: predicated region body
PF: predicated region fallthrough
CT: control target
= control target key end

     0   :  { %16 = vsyncpa [#allocation3], 0  ;;  %s1082_s0 = inlined_call_operand.hbm [shape: bf16[8,128], index: 0, kind: input, shape index: {}]   ;;  %s1083_s1 = inlined_call_operand.hbm [shape: bf16[128,128], index: 1, kind: input, shape index: {}]   ;;  %s1084_s2 = inlined_call_operand.vmem [shape: f32[1,128], index: 2, kind: input, shape index: {}]   ;;  %s1085_s3 = inlined_call_operand.hbm [shape: bf16[128,128], index: 3, kind: input, shape index: {}]   ;;  %s1086_s4 = inlined_call_operand.vmem [shape: f32[1,128], index: 4, kind: input, shape index: {}]   ;;  %s1087_s5 = inlined_call_operand.hbm [shape: bf16[128,128], index: 5, kind: input, shape index: {}]   ;;  %s1088_s6 = inlined_call_operand.vmem [shape: f32[1,128], index: 6, kind: input, shape index: {}]   ;;  %s1089_s7 = inlined_call_operand.hbm [shape: bf16[128,128], index: 7, kind: input, shape index: {}]   ;;  %s1090_s8 = inlined_call_operand.vmem [shape: f32[1,128], index: 8, kind: input, shape index: {}]   ;;  %s1091_s9 = inlined_call_operand.hbm [shape: bf16[128,128], index: 9, kind: input, shape index: {}]   ;;  %s1092_s10 = inlined_call_operand.vmem [shape: f32[1,128], index: 10, kind: input, shape index: {}]   ;;  %s1093_s11 = inlined_call_operand.hbm [shape: f32[8,128], index: 11, kind: output, shape index: {}]  }
   0x1   :  { %17 = vsyncpa [#allocation6], 0 }
   0x2   :  { %18 = vsyncpa [#allocation9], 0 }
   0x3   :  { %19 = vsyncpa [#allocation12], 0  ;;  %s36_s19 = sshll.u32 %s1083_s1, 4  ;;  %s37_s19 = int_to_ptr.hbm [resolvable:$true] %s36_s19 }
   0x4   :  { %20 = vsyncpa [#allocation4], 0  ;;  %s962_s20 = smov [#allocation5]   ;;  %s66_s24 = sshll.u32 %s1087_s5, 4  ;;  %s67_s24 = int_to_ptr.hbm [resolvable:$true] %s66_s24 }
   0x5   :  { %s38_s21 = sshll.u32 %s962_s20, 4  ;;  %s963_s25 = smov 64   ;;  %s39_s21 = int_to_ptr.vmem [resolvable:$true] %s38_s21 }
   0x6   :  { %s964_s26 = smov 4   ;;  %s965_s27 = smov [#allocation8]  }
   0x7   :  { %44 = dma.hbm_to_vmem [thread:$0]  %s37_s19, 1024, %s39_s21, [#allocation6], %s963_s25, %s963_s25, %s964_s26  }
   0x8   :  { %s68_s28 = sshll.u32 %s965_s27, 4  ;;  %s26_s30 = sshll.u32 %s1082_s0, 4  ;;  %s69_s28 = int_to_ptr.vmem [resolvable:$true] %s68_s28  ;;  %s27_s30 = int_to_ptr.hbm [resolvable:$true] %s26_s30 }
   0x9   :  { %74 = dma.hbm_to_vmem [thread:$0]  %s67_s24, 1024, %s69_s28, [#allocation9], %s963_s25, %s963_s25, %s964_s26  }
   0xa   :  { %s51_s13 = sshll.u32 %s1085_s3, 4  ;;  %s966_s14 = smov [#allocation2]   ;;  %s52_s13 = int_to_ptr.hbm [resolvable:$true] %s51_s13 }
   0xb   :  { %s28_s15 = sshll.u32 %s966_s14, 4  ;;  %s967_s16 = smov [#allocation7]   ;;  %s29_s15 = int_to_ptr.vmem [resolvable:$true] %s28_s15 }
   0xc   :  { %31 = dma.hbm_to_vmem [thread:$0]  %s27_s30, 64, %s29_s15, [#allocation3]  }
   0xd   :  { %s53_s17 = sshll.u32 %s967_s16, 4  ;;  %s81_s0 = sshll.u32 %s1089_s7, 4  ;;  %s54_s17 = int_to_ptr.vmem [resolvable:$true] %s53_s17  ;;  %s82_s0 = int_to_ptr.hbm [resolvable:$true] %s81_s0 }
   0xe   :  { %59 = dma.hbm_to_vmem [thread:$0]  %s52_s13, 1024, %s54_s17, [#allocation6], %s963_s25, %s963_s25, %s964_s26  }
   0xf   :  { %s96_s3 = sshll.u32 %s1091_s9, 4  ;;  %s968_s22 = smov [#allocation10]   ;;  %s97_s3 = int_to_ptr.hbm [resolvable:$true] %s96_s3 }
  0x10   :  { %s83_s23 = sshll.u32 %s968_s22, 4  ;;  %s969_s24 = smov [#allocation11]   ;;  %s84_s23 = int_to_ptr.vmem [resolvable:$true] %s83_s23 }
  0x11   :  { %89 = dma.hbm_to_vmem [thread:$0]  %s82_s0, 1024, %s84_s23, [#allocation9], %s963_s25, %s963_s25, %s964_s26  }
  0x12   :  { %s98_s7 = sshll.u32 %s969_s24, 4  ;;  %s99_s7 = int_to_ptr.vmem [resolvable:$true] %s98_s7 }
  0x13   :  { %104 = dma.hbm_to_vmem [thread:$0]  %s97_s3, 1024, %s99_s7, [#allocation12], %s963_s25, %s963_s25, %s964_s26  }
  0x14   :  { %952 = dma.done.wait [#allocation3], 64  }
  0x15   :  { %953 = vsyncadd [#allocation3], 4294967232 }
  0x16   :  { %954 = dma.done.wait [#allocation6], 2048  }
  0x17   :  { %955 = vsyncadd [#allocation6], 4294965248 }
  0x18   :  { %956 = dma.done.wait [#allocation9], 2048  }
  0x19   :  { %957 = vsyncadd [#allocation9], 4294965248 }
  0x1a   :  { %958 = dma.done.wait [#allocation12], 1024  }
  0x1b   :  { %959 = vsyncadd [#allocation12], 4294966272  ;;  %v737_v0 = vld [vmem:[#allocation5 + $0x38] sm:$0xff]  ;;  %v736_v1 = vld [vmem:[#allocation5 + $0x30] sm:$0xff]  ;;  %s970_s30 = smov [#allocation13]  }
  0x1c   :  { %200 = vmatpush.bf16.msra.mxu0 %v737_v0  ;;  %v745_v2 = vld [vmem:[#allocation7 + $0x38] sm:$0xff]  ;;  %v735_v3 = vld [vmem:[#allocation5 + $0x28] sm:$0xff]  ;;  %v744_v4 = vld [vmem:[#allocation7 + $0x30] sm:$0xff]  ;;  %s555_s5 = sshll.u32 %s970_s30, 4  ;;  %s556_s5 = int_to_ptr.vmem [resolvable:$true] %s555_s5 }
  0x1d   :  { %283 = vmatpush.bf16.msra.mxu1 %v745_v2  ;;  %v743_v5 = vld [vmem:[#allocation7 + $0x28] sm:$0xff]  ;;  %v734_v6 = vld [vmem:[#allocation5 + $0x20] sm:$0xff]  ;;  %v733_v8 = vld [vmem:[#allocation5 + $0x18] sm:$0xff] }
  0x1e   :  { %v742_v7 = vld [vmem:[#allocation7 + $0x20] sm:$0xff]  ;;  %v741_v9 = vld [vmem:[#allocation7 + $0x18] sm:$0xff]  ;;  %v732_v10 = vld [vmem:[#allocation5 + $0x10] sm:$0xff] }
  0x1f   :  { %v740_v11 = vld [vmem:[#allocation7 + $0x10] sm:$0xff]  ;;  %v731_v12 = vld [vmem:[#allocation5 + $0x8] sm:$0xff]  ;;  %v730_v13 = vld [vmem:[#allocation5] sm:$0xff] }
  0x20   :  { %201 = vmatpush.bf16.msra.mxu0 %v736_v1  ;;  %v131_v14 = vld [vmem:[#allocation2] sm:$0xf]  ;;  %v739_v15 = vld [vmem:[#allocation7 + $0x8] sm:$0xff]  ;;  %v738_v16 = vld [vmem:[#allocation7] sm:$0xff] }
  0x21   :  { %284 = vmatpush.bf16.msra.mxu1 %v744_v4  ;;  %v753_v17 = vld [vmem:[#allocation8 + $0x38] sm:$0xff]  ;;  %v752_v18 = vld [vmem:[#allocation8 + $0x30] sm:$0xff]  ;;  %v751_v19 = vld [vmem:[#allocation8 + $0x28] sm:$0xff] }
  0x22   :  { %366 = vmatpush.bf16.msra.mxu2 %v753_v17  ;;  %v750_v20 = vld [vmem:[#allocation8 + $0x20] sm:$0xff]  ;;  %v749_v21 = vld [vmem:[#allocation8 + $0x18] sm:$0xff]  ;;  %v748_v22 = vld [vmem:[#allocation8 + $0x10] sm:$0xff] }
  0x23   :  { %v779_v23 = vld [vmem:[%s1084_s2] ss:$0 sm:$0xff]  ;;  %v747_v29 = vld [vmem:[#allocation8 + $0x8] sm:$0xff]  ;;  %v746_v30 = vld [vmem:[#allocation8] sm:$0xff] }
  0x24   :  { %202 = vmatpush.bf16.msra.mxu0 %v735_v3  ;;  %v761_v31 = vld [vmem:[#allocation10 + $0x38] sm:$0xff]  ;;  %v760_v32 = vld [vmem:[#allocation10 + $0x30] sm:$0xff]  ;;  %v759_v33 = vld [vmem:[#allocation10 + $0x28] sm:$0xff] }
  0x25   :  { %285 = vmatpush.bf16.msra.mxu1 %v743_v5  ;;  %449 = vmatpush.bf16.msra.mxu3 %v761_v31  ;;  %v758_v34 = vld [vmem:[#allocation10 + $0x20] sm:$0xff]  ;;  %v757_v35 = vld [vmem:[#allocation10 + $0x18] sm:$0xff]  ;;  %v756_v36 = vld [vmem:[#allocation10 + $0x10] sm:$0xff] }
  0x26   :  { %367 = vmatpush.bf16.msra.mxu2 %v752_v18  ;;  %v780_v37 = vld [vmem:[%s1086_s4] ss:$0 sm:$0xff]  ;;  %v755_v43 = vld [vmem:[#allocation10 + $0x8] sm:$0xff]  ;;  %v754_v44 = vld [vmem:[#allocation10] sm:$0xff] }
  0x27   :  { %v769_v45 = vld [vmem:[#allocation11 + $0x38] sm:$0xff]  ;;  %v768_v46 = vld [vmem:[#allocation11 + $0x30] sm:$0xff]  ;;  %v767_v47 = vld [vmem:[#allocation11 + $0x28] sm:$0xff] }
  0x28   :  { %203 = vmatpush.bf16.msra.mxu0 %v734_v6  ;;  %v766_v48 = vld [vmem:[#allocation11 + $0x20] sm:$0xff]  ;;  %v781_v49 = vld [vmem:[%s1088_s6] ss:$0 sm:$0xff]  ;;  %v764_v56 = vld [vmem:[#allocation11 + $0x10] sm:$0xff] }
  0x29   :  { %286 = vmatpush.bf16.msra.mxu1 %v742_v7  ;;  %450 = vmatpush.bf16.msra.mxu3 %v760_v32  ;;  %v765_v55 = vld [vmem:[#allocation11 + $0x18] sm:$0xff]  ;;  %v763_v57 = vld [vmem:[#allocation11 + $0x8] sm:$0xff]  ;;  %v762_v58 = vld [vmem:[#allocation11] sm:$0xff] }
  0x2a   :  { %368 = vmatpush.bf16.msra.mxu2 %v751_v19  ;;  %v782_v59 = vld [vmem:[%s1090_s8] ss:$0 sm:$0xff]  ;;  %s557_s8 = sshll.u32 %s1093_s11, 4  ;;  %s558_s8 = int_to_ptr.hbm [resolvable:$true] %s557_s8 }
  0x2b   :  { %v783_v5 = vld [vmem:[%s1092_s10] ss:$0 sm:$0xff] }
  0x2c   :  { %204 = vmatpush.bf16.msra.mxu0 %v733_v8 }
  0x2d   :  { %287 = vmatpush.bf16.msra.mxu1 %v741_v9  ;;  %451 = vmatpush.bf16.msra.mxu3 %v759_v33 }
  0x2e   :  { %369 = vmatpush.bf16.msra.mxu2 %v750_v20 }
  0x30   :  { %205 = vmatpush.bf16.msra.mxu0 %v732_v10 }
  0x31   :  { %288 = vmatpush.bf16.msra.mxu1 %v740_v11  ;;  %452 = vmatpush.bf16.msra.mxu3 %v758_v34 }
  0x32   :  { %370 = vmatpush.bf16.msra.mxu2 %v749_v21 }
  0x34   :  { %206 = vmatpush.bf16.msra.mxu0 %v731_v12 }
  0x35   :  { %289 = vmatpush.bf16.msra.mxu1 %v739_v15  ;;  %453 = vmatpush.bf16.msra.mxu3 %v757_v35 }
  0x36   :  { %371 = vmatpush.bf16.msra.mxu2 %v748_v22 }
  0x38   :  { %207 = vmatpush.bf16.msra.mxu0 %v730_v13 }
  0x39   :  { %290 = vmatpush.bf16.msra.mxu1 %v738_v16  ;;  %454 = vmatpush.bf16.msra.mxu3 %v756_v36 }
  0x3a   :  { %372 = vmatpush.bf16.msra.mxu2 %v747_v29 }
  0x3b   :  { %208 = vmatmul.bf16.vlgmr.msra.gmra.mxu0 %v131_v14 }
  0x3c   :  { %536 = vmatpush.bf16.msrb.mxu0 %v769_v45 }
  0x3d   :  { %455 = vmatpush.bf16.msra.mxu3 %v755_v43 }
  0x3e   :  { %373 = vmatpush.bf16.msra.mxu2 %v746_v30 }
  0x40   :  { %537 = vmatpush.bf16.msrb.mxu0 %v768_v46 }
  0x41   :  { %456 = vmatpush.bf16.msra.mxu3 %v754_v44 }
  0x44   :  { %538 = vmatpush.bf16.msrb.mxu0 %v767_v47 }
  0x48   :  { %539 = vmatpush.bf16.msrb.mxu0 %v766_v48 }
  0x4c   :  { %540 = vmatpush.bf16.msrb.mxu0 %v765_v55 }
  0x50   :  { %541 = vmatpush.bf16.msrb.mxu0 %v764_v56 }
  0x54   :  { %542 = vmatpush.bf16.msrb.mxu0 %v763_v57 }
  0x58   :  { %543 = vmatpush.bf16.msrb.mxu0 %v762_v58 }
  0xb8   :  { %v209_v24 = vpop.f32.mrf.mxu0 }
  0xb9   :  { %v210_v25 = vadd.f32 %v779_v23, %v209_v24 }
  0xbb   :  { %v213_v26 = vmax.f32 %v210_v25, 0.0 }
  0xbd   :  { %v214_v27 = vpack.c.bf16 %v213_v26, %v213_v26 }
  0xbf   :  { %291 = vmatmul.bf16.vlgmr.msra.gmra.mxu1 %v214_v27 }
  0xc0   :  { %v211_v28 = vpop.f32.mrf.mxu0 }
 0x13c   :  { %v292_v38 = vpop.f32.mrf.mxu1 }
 0x13d   :  { %v293_v39 = vadd.f32 %v780_v37, %v292_v38 }
 0x13f   :  { %v296_v40 = vmax.f32 %v293_v39, 0.0 }
 0x141   :  { %v297_v41 = vpack.c.bf16 %v296_v40, %v296_v40 }
 0x143   :  { %374 = vmatmul.bf16.vlgmr.msra.gmra.mxu2 %v297_v41 }
 0x144   :  { %v294_v42 = vpop.f32.mrf.mxu1 }
 0x1c6   :  { %v375_v50 = vpop.f32.mrf.mxu2 }
 0x1c7   :  { %v376_v51 = vadd.f32 %v781_v49, %v375_v50 }
 0x1c9   :  { %v379_v52 = vmax.f32 %v376_v51, 0.0 }
 0x1cb   :  { %v380_v53 = vpack.c.bf16 %v379_v52, %v379_v52 }
 0x1cd   :  { %457 = vmatmul.bf16.vlgmr.msra.gmra.mxu3 %v380_v53 }
 0x1ce   :  { %v377_v54 = vpop.f32.mrf.mxu2 }
 0x250   :  { %v458_v60 = vpop.f32.mrf.mxu3 }
 0x251   :  { %v459_v61 = vadd.f32 %v782_v59, %v458_v60 }
 0x253   :  { %v462_v62 = vadd.f32 3.0, %v459_v61 }
 0x255   :  { %v463_v63 = vmax.f32 %v462_v62, 0.0 }
 0x257   :  { %v464_v0 = vmin.f32 %v463_v63, 6.0 }
 0x258   :  { %v460_v1 = vpop.f32.mrf.mxu3 }
 0x259   :  { %v465_v2 = vmul.f32 %v464_v0, %v459_v61 }
 0x25b   :  { %v466_v3 = vmul.f32 0.16666667, %v465_v2 }
 0x25d   :  { %v467_v4 = vpack.c.bf16 %v466_v3, %v466_v3 }
 0x25f   :  { %544 = vmatmul.bf16.vlgmr.msrb.gmra.mxu0 %v467_v4 }
 0x2dc   :  { %v545_v6 = vpop.f32.mrf.mxu0 }
 0x2dd   :  { %v546_v7 = vadd.f32 %v783_v5, %v545_v6 }
 0x2df   :  { %549 = vst [vmem:[#allocation13] sm:$0xff] %v546_v7 }
 0x2e0   :  { %560 = dma.vmem_to_hbm [thread:$0]  %s556_s5, 128, %s558_s8, [#allocation4]  }
 0x2e4   :  { %v547_v8 = vpop.f32.mrf.mxu0 }
 0x2e5   :  { %960 = dma.done.wait [#allocation4], 128  }
 0x2e6   :  { %961 = vsyncadd [#allocation4], 4294967168 }
 0x2e7   :  { %565 = vsyncpa [#allocation3], 1 }
 0x2e8   :  { %566 = vsyncpa [#allocation6], 1 }
 0x2e9   :  { %567 = vsyncpa [#allocation9], 1 }
 0x2ea   :  { %568 = vsyncpa [#allocation12], 1 }
 0x2eb   :  { %569 = vsyncpa [#allocation4], 1 }

</bundles_post_ra>
